<compile_context>
chip_gen: v7x
topology: tpu7x:2x2x1
jax: 0.10.0
libtpu: 0.0.40
codegen_flags: <defaults>
</compile_context>

<pallas_src>
import math
from functools import partial

import jax
import jax.numpy as jnp
from jax.experimental import pallas as pl
from jax.experimental.pallas import tpu as pltpu

LANE = 128


def _round_up(x, m):
    return ((x + m - 1) // m) * m


def _cdiv(a, b):
    return -(-a // b)


def _use_bf16_elementwise():
    """bf16 VALU elementwise only on v6e / v7x; f32 everywhere else (safe default)."""
    try:
        kind = jax.devices()[0].device_kind.lower()
    except Exception:
        return False
    if "v6" in kind or "v7" in kind or "7x" in kind:
        return True
    return False


def _batch_tiling(B, tile_m, min_split_tile=128, prefer_splits=2):
    """Balanced batch split: tiles <= tile_m, multiple of 8, and >= prefer_splits
    tiles (for v7x megacore) whenever each split would still be >= min_split_tile."""
    n = _cdiv(B, tile_m)
    if n < prefer_splits and B >= prefer_splits * min_split_tile:
        n = prefer_splits
    tm = _round_up(_cdiv(B, n), 8)
    b_pad = _round_up(B, tm)
    return tm, b_pad


def actor_kernel(x_ref, w1_ref, b12_ref, w2_ref, w3_ref, b3_ref, o_ref, *,
                 action_size, bf16_elementwise):
    # fc1 + ReLU  (bf16 MXU operands, f32 accumulation)
    h1 = jnp.dot(x_ref[...], w1_ref[...], preferred_element_type=jnp.float32)
    if bf16_elementwise:
        h1 = jnp.maximum(
            h1.astype(jnp.bfloat16) + b12_ref[0:1, :].astype(jnp.bfloat16), 0.0)
    else:
        h1 = jnp.maximum(h1 + b12_ref[0:1, :], 0.0).astype(jnp.bfloat16)

    # fc2 + ReLU
    h2 = jnp.dot(h1, w2_ref[...], preferred_element_type=jnp.float32)
    if bf16_elementwise:
        h2 = jnp.maximum(
            h2.astype(jnp.bfloat16) + b12_ref[1:2, :].astype(jnp.bfloat16), 0.0)
    else:
        h2 = jnp.maximum(h2 + b12_ref[1:2, :], 0.0).astype(jnp.bfloat16)

    # fc3 + tanh.  Matmul runs on the 128-lane padded w3 (MXU-friendly); only the
    # real action columns are biased, tanh'd, and stored (tiny HBM writeback).
    h3 = jnp.dot(h2, w3_ref[...], preferred_element_type=jnp.float32)
    h3 = h3[:, :action_size] + b3_ref[...]
    o_ref[...] = jnp.tanh(h3).astype(o_ref.dtype)


def actor_forward(state, params, tile_m=1024, bf16_elementwise=None):
    """state: (B, state_size) f32 or bf16. Returns (B, action_size) f32."""
    if bf16_elementwise is None:
        bf16_elementwise = _use_bf16_elementwise()

    w1, b12, w2, w3p, b3 = (
        params["w1"], params["b12"], params["w2"], params["w3_pad"], params["b3"]
    )
    action_size = params["action_size"]

    B, S = state.shape
    F1 = w1.shape[1]
    F2 = w2.shape[1]
    A_pad = w3p.shape[1]

    # Cast state to bf16 in the wrapper (halves state DMA, no in-kernel convert).
    state = state.astype(jnp.bfloat16)

    # Balanced batch tiling; guarantees >=2 grid steps for large B (v7x megacore).
    TM, B_pad = _batch_tiling(B, tile_m)
    if B_pad != B:
        state = jnp.pad(state, ((0, B_pad - B), (0, 0)))

    grid = (B_pad // TM,)

    grid_spec = pltpu.PrefetchScalarGridSpec(
        num_scalar_prefetch=0,
        grid=grid,
        in_specs=[
            pl.BlockSpec((TM, S), lambda i: (i, 0)),        # state tile, streamed (bf16)
            pl.BlockSpec((S, F1), lambda i: (0, 0)),        # w1: VMEM-resident
            pl.BlockSpec((2, F1), lambda i: (0, 0)),        # packed b1/b2 (f32)
            pl.BlockSpec((F1, F2), lambda i: (0, 0)),       # w2
            pl.BlockSpec((F2, A_pad), lambda i: (0, 0)),    # w3 (lane-padded for MXU)
            pl.BlockSpec((1, action_size), lambda i: (0, 0)),  # b3 (real columns only)
        ],
        out_specs=pl.BlockSpec((TM, action_size), lambda i: (i, 0)),
    )

    out = pl.pallas_call(
        partial(actor_kernel, action_size=action_size,
                bf16_elementwise=bf16_elementwise),
        out_shape=jax.ShapeDtypeStruct((B_pad, action_size), jnp.float32),
        grid_spec=grid_spec,
        compiler_params=pltpu.CompilerParams(
            dimension_semantics=("parallel",),
        ),
    )(state, w1, b12, w2, w3p, b3)

    return out if B_pad == B else out[:B]


def init_actor_params(key, state_size, action_size, fc1_units=256, fc2_units=256):
    """Init mirroring the PyTorch module:
    fc1/fc2 weights xavier_normal_, fc3 weight xavier_uniform_,
    biases PyTorch default uniform(-1/sqrt(fan_in), 1/sqrt(fan_in)).
    Weights returned transposed to (in, out) and stored in bf16 (MXU operands);
    biases kept f32. w3 is lane-padded to a multiple of 128 for the MXU."""
    k1, k2, k3, kb1, kb2, kb3 = jax.random.split(key, 6)

    def xavier_normal(k, fan_in, fan_out):
        std = math.sqrt(2.0 / (fan_in + fan_out))
        return std * jax.random.normal(k, (fan_in, fan_out), dtype=jnp.float32)

    def xavier_uniform(k, fan_in, fan_out):
        a = math.sqrt(6.0 / (fan_in + fan_out))
        return jax.random.uniform(k, (fan_in, fan_out), dtype=jnp.float32, minval=-a, maxval=a)

    def default_bias(k, fan_in, fan_out):
        bound = 1.0 / math.sqrt(fan_in)
        return jax.random.uniform(k, (1, fan_out), dtype=jnp.float32, minval=-bound, maxval=bound)

    w1 = xavier_normal(k1, state_size, fc1_units)
    w2 = xavier_normal(k2, fc1_units, fc2_units)
    w3 = xavier_uniform(k3, fc2_units, action_size)
    b1 = default_bias(kb1, state_size, fc1_units)
    b2 = default_bias(kb2, fc1_units, fc2_units)
    b3 = default_bias(kb3, fc2_units, action_size)

    a_pad = _round_up(action_size, LANE)
    w3_pad = jnp.zeros((fc2_units, a_pad), jnp.float32).at[:, :action_size].set(w3)

    return {
        "w1": w1.astype(jnp.bfloat16),
        "w2": w2.astype(jnp.bfloat16),
        "w3_pad": w3_pad.astype(jnp.bfloat16),
        "b12": jnp.concatenate([b1, b2], axis=0),   # (2, fc_units) f32
        "b3": b3,                                   # (1, action_size) f32
        "action_size": action_size,
    }


def actor_reference(state, params, bf16_elementwise):
    """Same math as the kernel (bf16 dot operands, f32 acc, matching elementwise path)."""
    b1 = params["b12"][0:1, :]
    b2 = params["b12"][1:2, :]
    x = state.astype(jnp.bfloat16)

    h1 = jnp.dot(x, params["w1"], preferred_element_type=jnp.float32)
    if bf16_elementwise:
        h1 = jnp.maximum(h1.astype(jnp.bfloat16) + b1.astype(jnp.bfloat16), 0.0)
    else:
        h1 = jnp.maximum(h1 + b1, 0.0).astype(jnp.bfloat16)

    h2 = jnp.dot(h1, params["w2"], preferred_element_type=jnp.float32)
    if bf16_elementwise:
        h2 = jnp.maximum(h2.astype(jnp.bfloat16) + b2.astype(jnp.bfloat16), 0.0)
    else:
        h2 = jnp.maximum(h2 + b2, 0.0).astype(jnp.bfloat16)

    h3 = jnp.dot(h2, params["w3_pad"], preferred_element_type=jnp.float32)
    h3 = h3[:, : params["action_size"]] + params["b3"]
    return jnp.tanh(h3)


if __name__ == "__main__":
    batch = 8
    state_size = 32
    action_size = 4
    fc1_units = 256
    fc2_units = 256

    key = jax.random.PRNGKey(0)
    k_params, k_state = jax.random.split(key)
    params = init_actor_params(k_params, state_size, action_size, fc1_units, fc2_units)
    state = jax.random.normal(k_state, (batch, state_size), dtype=jnp.float32)

    bf16_ew = _use_bf16_elementwise()

    out = actor_forward(state, params, bf16_elementwise=bf16_ew)
    out = jax.block_until_ready(out)

    ref = jax.block_until_ready(actor_reference(state, params, bf16_ew))
    assert out.shape == (batch, action_size)
    assert jnp.allclose(out, ref, atol=1e-2, rtol=1e-2), "Pallas output mismatch vs JAX reference"

    print("KERNEL_OK")
</pallas_src>

<mosaic_0001>
module attributes {stable_mosaic.version = 11 : i64} {
  func.func @actor_kernel(%arg0: i32, %arg1: memref<8x32xbf16, #tpu.memory_space<vmem>>, %arg2: memref<32x256xbf16, #tpu.memory_space<vmem>>, %arg3: memref<2x256xf32, #tpu.memory_space<vmem>>, %arg4: memref<256x256xbf16, #tpu.memory_space<vmem>>, %arg5: memref<256x128xbf16, #tpu.memory_space<vmem>>, %arg6: memref<1x4xf32, #tpu.memory_space<vmem>>, %arg7: memref<8x4xf32, #tpu.memory_space<vmem>>) attributes {dimension_semantics = [#tpu.dimension_semantics<parallel>], iteration_bounds = array<i64: 1>, scalar_prefetch = 0 : i64, scratch_operands = 0 : i64, tpu.core_type = #tpu.core_type<tc>, window_params = [{transform_indices = @transform_0, window_bounds = array<i64: 8, 32>}, {pipeline_mode = #tpu.pipeline_mode<synchronous>, transform_indices = @transform_1, window_bounds = array<i64: 32, 256>}, {pipeline_mode = #tpu.pipeline_mode<synchronous>, transform_indices = @transform_2, window_bounds = array<i64: 2, 256>}, {pipeline_mode = #tpu.pipeline_mode<synchronous>, transform_indices = @transform_3, window_bounds = array<i64: 256, 256>}, {pipeline_mode = #tpu.pipeline_mode<synchronous>, transform_indices = @transform_4, window_bounds = array<i64: 256, 128>}, {pipeline_mode = #tpu.pipeline_mode<synchronous>, transform_indices = @transform_5, window_bounds = array<i64: 1, 4>}, {transform_indices = @transform_6, window_bounds = array<i64: 8, 4>}]} {
    %c0 = arith.constant 0 : index
    %c0_0 = arith.constant 0 : index
    %0 = vector.load %arg1[%c0, %c0_0] : memref<8x32xbf16, #tpu.memory_space<vmem>>, vector<8x32xbf16>
    %c0_1 = arith.constant 0 : index
    %c0_2 = arith.constant 0 : index
    %1 = vector.load %arg2[%c0_1, %c0_2] : memref<32x256xbf16, #tpu.memory_space<vmem>>, vector<32x256xbf16>
    %cst = arith.constant dense<0.000000e+00> : vector<8x256xf32>
    %2 = tpu.matmul %0, %1, %cst {dimension_numbers = #tpu.dot_dimension_numbers<[1], [0], [0], [1], [0, 0, 1, 1], [], []>} : vector<8x32xbf16>, vector<32x256xbf16>, vector<8x256xf32> -> vector<8x256xf32>
    %c0_3 = arith.constant 0 : index
    %c0_4 = arith.constant 0 : index
    %3 = vector.load %arg3[%c0_3, %c0_4] : memref<2x256xf32, #tpu.memory_space<vmem>>, vector<1x256xf32>
    %4 = vector.broadcast %3 : vector<1x256xf32> to vector<8x256xf32>
    %5 = arith.addf %2, %4 : vector<8x256xf32>
    %cst_5 = arith.constant 0.000000e+00 : f32
    %6 = vector.broadcast %cst_5 : f32 to vector<8x256xf32>
    %7 = arith.maximumf %5, %6 : vector<8x256xf32>
    %8 = arith.truncf %7 : vector<8x256xf32> to vector<8x256xbf16>
    %c0_6 = arith.constant 0 : index
    %c0_7 = arith.constant 0 : index
    %9 = vector.load %arg4[%c0_6, %c0_7] : memref<256x256xbf16, #tpu.memory_space<vmem>>, vector<256x256xbf16>
    %cst_8 = arith.constant dense<0.000000e+00> : vector<8x256xf32>
    %10 = tpu.matmul %8, %9, %cst_8 {dimension_numbers = #tpu.dot_dimension_numbers<[1], [0], [0], [1], [0, 0, 1, 1], [], []>} : vector<8x256xbf16>, vector<256x256xbf16>, vector<8x256xf32> -> vector<8x256xf32>
    %c1 = arith.constant 1 : index
    %c0_9 = arith.constant 0 : index
    %11 = vector.load %arg3[%c1, %c0_9] : memref<2x256xf32, #tpu.memory_space<vmem>>, vector<1x256xf32>
    %12 = vector.broadcast %11 : vector<1x256xf32> to vector<8x256xf32>
    %13 = arith.addf %10, %12 : vector<8x256xf32>
    %cst_10 = arith.constant 0.000000e+00 : f32
    %14 = vector.broadcast %cst_10 : f32 to vector<8x256xf32>
    %15 = arith.maximumf %13, %14 : vector<8x256xf32>
    %16 = arith.truncf %15 : vector<8x256xf32> to vector<8x256xbf16>
    %c0_11 = arith.constant 0 : index
    %c0_12 = arith.constant 0 : index
    %17 = vector.load %arg5[%c0_11, %c0_12] : memref<256x128xbf16, #tpu.memory_space<vmem>>, vector<256x128xbf16>
    %cst_13 = arith.constant dense<0.000000e+00> : vector<8x128xf32>
    %18 = tpu.matmul %16, %17, %cst_13 {dimension_numbers = #tpu.dot_dimension_numbers<[1], [0], [0], [1], [0, 0, 1, 1], [], []>} : vector<8x256xbf16>, vector<256x128xbf16>, vector<8x128xf32> -> vector<8x128xf32>
    %19 = vector.extract_strided_slice %18 {offsets = [0, 0], sizes = [8, 4], strides = [1, 1]} : vector<8x128xf32> to vector<8x4xf32>
    %c0_14 = arith.constant 0 : index
    %c0_15 = arith.constant 0 : index
    %20 = vector.load %arg6[%c0_14, %c0_15] : memref<1x4xf32, #tpu.memory_space<vmem>>, vector<1x4xf32>
    %21 = vector.broadcast %20 : vector<1x4xf32> to vector<8x4xf32>
    %22 = arith.addf %19, %21 : vector<8x4xf32>
    %23 = math.tanh %22 : vector<8x4xf32>
    %c0_16 = arith.constant 0 : index
    %c0_17 = arith.constant 0 : index
    %24 = vector.load %arg7[%c0_16, %c0_17] : memref<8x4xf32, #tpu.memory_space<vmem>>, vector<8x4xf32>
    tpu.vector_store %arg7[%c0_16, %c0_17], %23 {strides = array<i32>} : memref<8x4xf32, #tpu.memory_space<vmem>>, vector<8x4xf32>,
    return
  }
  func.func @transform_0(%arg0: i32) -> (i32, i32) {
    %c0_i32 = arith.constant 0 : i32
    %c0_i32_0 = arith.constant 0 : i32
    return %arg0, %c0_i32 : i32, i32
  }
  func.func @transform_1(%arg0: i32) -> (i32, i32) {
    %c0_i32 = arith.constant 0 : i32
    %c0_i32_0 = arith.constant 0 : i32
    %c0_i32_1 = arith.constant 0 : i32
    return %c0_i32, %c0_i32_0 : i32, i32
  }
  func.func @transform_2(%arg0: i32) -> (i32, i32) {
    %c0_i32 = arith.constant 0 : i32
    %c0_i32_0 = arith.constant 0 : i32
    %c0_i32_1 = arith.constant 0 : i32
    return %c0_i32, %c0_i32_0 : i32, i32
  }
  func.func @transform_3(%arg0: i32) -> (i32, i32) {
    %c0_i32 = arith.constant 0 : i32
    %c0_i32_0 = arith.constant 0 : i32
    %c0_i32_1 = arith.constant 0 : i32
    return %c0_i32, %c0_i32_0 : i32, i32
  }
  func.func @transform_4(%arg0: i32) -> (i32, i32) {
    %c0_i32 = arith.constant 0 : i32
    %c0_i32_0 = arith.constant 0 : i32
    %c0_i32_1 = arith.constant 0 : i32
    return %c0_i32, %c0_i32_0 : i32, i32
  }
  func.func @transform_5(%arg0: i32) -> (i32, i32) {
    %c0_i32 = arith.constant 0 : i32
    %c0_i32_0 = arith.constant 0 : i32
    %c0_i32_1 = arith.constant 0 : i32
    return %c0_i32, %c0_i32_0 : i32, i32
  }
  func.func @transform_6(%arg0: i32) -> (i32, i32) {
    %c0_i32 = arith.constant 0 : i32
    %c0_i32_0 = arith.constant 0 : i32
    return %arg0, %c0_i32 : i32, i32
  }
}

</mosaic_0001>

<bundles_post_ra>
// kernel: tpu_custom_call.1
= control target key start
LH: loop header
LB: loop body
LE: loop exit
PB: predicated region body
PF: predicated region fallthrough
CT: control target
= control target key end

     0   :  { %11 = vsyncpa [#allocation3], 0  ;;  %s961_s0 = inlined_call_operand.hbm [shape: bf16[8,32], index: 0, kind: input, shape index: {}]   ;;  %s962_s1 = inlined_call_operand.hbm [shape: bf16[32,256], index: 1, kind: input, shape index: {}]   ;;  %s963_s2 = inlined_call_operand.vmem [shape: f32[2,256], index: 2, kind: input, shape index: {}]   ;;  %s964_s3 = inlined_call_operand.hbm [shape: bf16[256,256], index: 3, kind: input, shape index: {}]   ;;  %s965_s4 = inlined_call_operand.hbm [shape: bf16[256,128], index: 4, kind: input, shape index: {}]   ;;  %s966_s5 = inlined_call_operand.vmem [shape: f32[1,4], index: 5, kind: input, shape index: {}]   ;;  %s967_s6 = inlined_call_operand.vmem [shape: f32[8,4], index: 6, kind: output, shape index: {}]  }
   0x1   :  { %12 = vsyncpa [#allocation5], 0 }
   0x2   :  { %13 = vsyncpa [#allocation8], 0  ;;  %s851_s21 = smov [#allocation4]   ;;  %s757_s25 = scalar_lea.hbm %s962_s1, 512 }
   0x3   :  { %s29_s22 = sshll.u32 %s851_s21, 4  ;;  %p758_p0 = scmp.ne.s32.totalorder %s962_s1, %s757_s25  ;;  %s30_s22 = int_to_ptr.vmem [resolvable:$true] %s29_s22 }
   0x4   :  { %p761_p1 = scmp.lt.u32.totalorder %s757_s25, %s962_s1 }
   0x6   :  { %p763_p2 = pnand %p761_p1, %p758_p0 }
   0x8   :  { %766 = shalt.err (!%p763_p2)
}
   0x9   :  { %s767_s30 = scalar_lea.vmem %s30_s22, 512  ;;  %p772_p4 = scmp.lt.s32.totalorder %s30_s22, %s30_s22 }
   0xa   :  { %p768_p3 = scmp.ne.s32.totalorder %s30_s22, %s767_s30  ;;  %p773_p5 = scmp.lt.s32.totalorder %s767_s30, %s767_s30 }
   0xc   :  { %p774_p6 = por %p773_p5, %p772_p4 }
   0xe   :  { %p775_p7 = pnand %p774_p6, %p768_p3 }
  0x10   :  { %778 = shalt.err (!%p775_p7)
}
  0x11   :  { %s852_s7 = smov 128   ;;  %s853_s8 = smov 8  }
  0x12   :  { %35 = dma.hbm_to_vmem [thread:$0]  %s962_s1, 512, %s30_s22, [#allocation5], %s852_s7, %s852_s7, %s853_s8  }
  0x13   :  { %s854_s11 = smov [#allocation2]   ;;  %s855_s13 = smov [#allocation6]  }
  0x14   :  { %s20_s12 = sshll.u32 %s854_s11, 4  ;;  %s43_s14 = sshll.u32 %s855_s13, 4  ;;  %s21_s12 = int_to_ptr.vmem [resolvable:$true] %s20_s12  ;;  %s44_s14 = int_to_ptr.vmem [resolvable:$true] %s43_s14 }
  0x15   :  { %s779_s17 = scalar_lea.hbm %s961_s0, 64 }
  0x16   :  { %p780_p8 = scmp.ne.s32.totalorder %s961_s0, %s779_s17  ;;  %p783_p9 = scmp.lt.u32.totalorder %s779_s17, %s961_s0 }
  0x18   :  { %p785_p10 = pnand %p783_p9, %p780_p8 }
  0x1a   :  { %788 = shalt.err (!%p785_p10)
}
  0x1b   :  { %s789_s1 = scalar_lea.vmem %s21_s12, 64  ;;  %p794_p12 = scmp.lt.s32.totalorder %s21_s12, %s21_s12 }
  0x1c   :  { %p790_p11 = scmp.ne.s32.totalorder %s21_s12, %s789_s1  ;;  %p795_p13 = scmp.lt.s32.totalorder %s789_s1, %s789_s1 }
  0x1e   :  { %p796_p0 = por %p795_p13, %p794_p12 }
  0x20   :  { %p797_p1 = pnand %p796_p0, %p790_p11 }
  0x22   :  { %800 = shalt.err (!%p797_p1)
}
  0x23   :  { %23 = dma.hbm_to_vmem [thread:$0]  %s961_s0, 64, %s21_s12, [#allocation3]  }
  0x24   :  { %s801_s26 = scalar_lea.hbm %s964_s3, 4096 }
  0x25   :  { %p802_p2 = scmp.ne.s32.totalorder %s964_s3, %s801_s26  ;;  %p805_p3 = scmp.lt.u32.totalorder %s801_s26, %s964_s3 }
  0x27   :  { %p807_p4 = pnand %p805_p3, %p802_p2 }
  0x29   :  { %810 = shalt.err (!%p807_p4)
}
  0x2a   :  { %s811_s9 = scalar_lea.vmem %s44_s14, 4096  ;;  %p816_p6 = scmp.lt.s32.totalorder %s44_s14, %s44_s14 }
  0x2b   :  { %p812_p5 = scmp.ne.s32.totalorder %s44_s14, %s811_s9  ;;  %p817_p7 = scmp.lt.s32.totalorder %s811_s9, %s811_s9 }
  0x2d   :  { %p818_p8 = por %p817_p7, %p816_p6 }
  0x2f   :  { %p819_p9 = pnand %p818_p8, %p812_p5 }
  0x31   :  { %822 = shalt.err (!%p819_p9)
}
  0x32   :  { %49 = dma.hbm_to_vmem [thread:$0]  %s964_s3, 4096, %s44_s14, [#allocation5], %s852_s7, %s852_s7, %s853_s8  }
  0x33   :  { %s856_s11 = smov [#allocation7]   ;;  %s823_s16 = scalar_lea.hbm %s965_s4, 2048 }
  0x34   :  { %s55_s12 = sshll.u32 %s856_s11, 4  ;;  %p824_p10 = scmp.ne.s32.totalorder %s965_s4, %s823_s16  ;;  %s56_s12 = int_to_ptr.vmem [resolvable:$true] %s55_s12 }
  0x35   :  { %p827_p11 = scmp.lt.u32.totalorder %s823_s16, %s965_s4 }
  0x37   :  { %p829_p12 = pnand %p827_p11, %p824_p10 }
  0x39   :  { %832 = shalt.err (!%p829_p12)
}
  0x3a   :  { %s833_s21 = scalar_lea.vmem %s56_s12, 2048  ;;  %p838_p0 = scmp.lt.s32.totalorder %s56_s12, %s56_s12 }
  0x3b   :  { %p834_p13 = scmp.ne.s32.totalorder %s56_s12, %s833_s21  ;;  %p839_p1 = scmp.lt.s32.totalorder %s833_s21, %s833_s21 }
  0x3d   :  { %p840_p2 = por %p839_p1, %p838_p0 }
  0x3f   :  { %p841_p3 = pnand %p840_p2, %p834_p13 }
  0x41   :  { %844 = shalt.err (!%p841_p3)
}
  0x42   :  { %s857_s3 = smov 64   ;;  %s858_s7 = smov 4  }
  0x43   :  { %61 = dma.hbm_to_vmem [thread:$0]  %s965_s4, 2048, %s56_s12, [#allocation8], %s857_s3, %s857_s3, %s858_s7  }
  0x44   :  { %845 = dma.done.wait [#allocation3], 64  }
  0x45   :  { %846 = vsyncadd [#allocation3], 4294967232 }
  0x46   :  { %847 = dma.done.wait [#allocation5], 4608  }
  0x47   :  { %848 = vsyncadd [#allocation5], 4294962688 }
  0x48   :  { %849 = dma.done.wait [#allocation8], 2048  }
  0x49   :  { %850 = vsyncadd [#allocation8], 4294965248  ;;  %v859_v0 = vmov 0   ;;  %v685_v1 = vld [vmem:[#allocation4 + $0x4] ss:$8 sps:$4 sm:$0xff]   ;;  %vm114_vm0 = vcmask 261120   ;;  %v84_v50 = vlaneseq }
  0x4a   :  { %150 = vmatprep.mubr.bf16.mxu0 %v859_v0  ;;  %v687_v2 = vld [vmem:[#allocation4] ss:$8 sps:$4 sm:$0xff]   ;;  %118 = vmatprep.subr.bf16.mxu0 %v685_v1  ;;  %v688_v3 = vld [vmem:[#allocation4 + $0x14] ss:$8 sps:$4 sm:$0xff]   ;;  %v690_v4 = vld [vmem:[#allocation4 + $0x10] ss:$8 sps:$4 sm:$0xff]  }
  0x4b   :  { %119 = vmatpush1.bf16.msra.mxu0 %v687_v2  ;;  %v691_v5 = vld [vmem:[#allocation6 + $0x4] ss:$8 sps:$4 sm:$0xff]   ;;  %v693_v6 = vld [vmem:[#allocation6] ss:$8 sps:$4 sm:$0xff]   ;;  %v694_v7 = vld [vmem:[#allocation6 + $0x14] ss:$8 sps:$4 sm:$0xff]  }
  0x4c   :  { %120 = vmatprep.subr.bf16.mxu0 %v688_v3  ;;  %368 = vmatprep.subr.bf16.mxu1 %v691_v5  ;;  %v77_v8 = vld [vmem:[#allocation2] sm:$0xf]  ;;  %v696_v9 = vld [vmem:[#allocation6 + $0x10] ss:$8 sps:$4 sm:$0xff]   ;;  %v697_v10 = vld [vmem:[#allocation6 + $0x24] ss:$8 sps:$4 sm:$0xff]  }
  0x4d   :  { %369 = vmatpush1.bf16.msra.mxu1 %v693_v6  ;;  %v699_v11 = vld [vmem:[#allocation6 + $0x20] ss:$8 sps:$4 sm:$0xff]   ;;  %v700_v12 = vld [vmem:[#allocation6 + $0x34] ss:$8 sps:$4 sm:$0xff]   ;;  %v702_v13 = vld [vmem:[#allocation6 + $0x30] ss:$8 sps:$4 sm:$0xff]  }
  0x4e   :  { %370 = vmatprep.subr.bf16.mxu1 %v694_v7  ;;  %v703_v14 = vld [vmem:[#allocation6 + $0x44] ss:$8 sps:$4 sm:$0xff]   ;;  %v705_v15 = vld [vmem:[#allocation6 + $0x40] ss:$8 sps:$4 sm:$0xff]   ;;  %v706_v16 = vld [vmem:[#allocation6 + $0x54] ss:$8 sps:$4 sm:$0xff]  }
  0x4f   :  { %121 = vmatpush1.bf16.msra.mxu0 %v690_v4  ;;  %v708_v17 = vld [vmem:[#allocation6 + $0x50] ss:$8 sps:$4 sm:$0xff]   ;;  %v709_v18 = vld [vmem:[#allocation6 + $0x64] ss:$8 sps:$4 sm:$0xff]   ;;  %v711_v19 = vld [vmem:[#allocation6 + $0x60] ss:$8 sps:$4 sm:$0xff]  }
  0x50   :  { %v712_v20 = vld [vmem:[#allocation6 + $0x74] ss:$8 sps:$4 sm:$0xff]   ;;  %v714_v21 = vld [vmem:[#allocation6 + $0x70] ss:$8 sps:$4 sm:$0xff]   ;;  %v715_v22 = vld [vmem:[#allocation6 + $0x84] ss:$8 sps:$4 sm:$0xff]  }
  0x51   :  { %371 = vmatpush1.bf16.msra.mxu1 %v696_v9  ;;  %v717_v23 = vld [vmem:[#allocation6 + $0x80] ss:$8 sps:$4 sm:$0xff]   ;;  %v718_v24 = vld [vmem:[#allocation6 + $0x94] ss:$8 sps:$4 sm:$0xff]   ;;  %v720_v25 = vld [vmem:[#allocation6 + $0x90] ss:$8 sps:$4 sm:$0xff]  }
  0x52   :  { %603 = vmatmul.mubr.msk.bf16.vlgmr.msra.gmra.mrb[0].mxu0 %vm114_vm0, %v77_v8  ;;  %372 = vmatprep.subr.bf16.mxu1 %v697_v10  ;;  %v721_v26 = vld [vmem:[#allocation6 + $0xa4] ss:$8 sps:$4 sm:$0xff]   ;;  %v723_v27 = vld [vmem:[#allocation6 + $0xa0] ss:$8 sps:$4 sm:$0xff]   ;;  %v724_v28 = vld [vmem:[#allocation6 + $0xb4] ss:$8 sps:$4 sm:$0xff]  }
  0x53   :  { %v726_v29 = vld [vmem:[#allocation6 + $0xb0] ss:$8 sps:$4 sm:$0xff]   ;;  %v727_v30 = vld [vmem:[#allocation6 + $0xc4] ss:$8 sps:$4 sm:$0xff]   ;;  %v729_v31 = vld [vmem:[#allocation6 + $0xc0] ss:$8 sps:$4 sm:$0xff]  }
  0x54   :  { %v730_v32 = vld [vmem:[#allocation6 + $0xd4] ss:$8 sps:$4 sm:$0xff]   ;;  %v732_v33 = vld [vmem:[#allocation6 + $0xd0] ss:$8 sps:$4 sm:$0xff]   ;;  %v733_v34 = vld [vmem:[#allocation6 + $0xe4] ss:$8 sps:$4 sm:$0xff]  }
  0x55   :  { %373 = vmatpush1.bf16.msra.mxu1 %v699_v11  ;;  %v735_v35 = vld [vmem:[#allocation6 + $0xe0] ss:$8 sps:$4 sm:$0xff]   ;;  %v736_v36 = vld [vmem:[#allocation6 + $0xf4] ss:$8 sps:$4 sm:$0xff]   ;;  %v738_v37 = vld [vmem:[#allocation6 + $0xf0] ss:$8 sps:$4 sm:$0xff]  }
  0x56   :  { %374 = vmatprep.subr.bf16.mxu1 %v700_v12  ;;  %v739_v38 = vld [vmem:[#allocation7 + $0x40] sm:$0xff]   ;;  %v741_v40 = vld [vmem:[#allocation7 + $0x48] sm:$0xff]   ;;  %v743_v42 = vld [vmem:[#allocation7 + $0x50] sm:$0xff]   ;;  %v85_v51 = vshrl.u32 %v84_v50, 7  ;;  %vm590_vm1 = vcmask 31744  }
  0x57   :  { %v740_v39 = vld [vmem:[#allocation7] sm:$0xff]   ;;  %654 = vmatprep.subr.bf16.mxu0 %v739_v38  ;;  %v742_v41 = vld [vmem:[#allocation7 + $0x8] sm:$0xff]   ;;  %v744_v43 = vld [vmem:[#allocation7 + $0x10] sm:$0xff]  }
  0x58   :  { %655 = vmatpush3.bf16.msra.mxu0 %v740_v39  ;;  %v745_v44 = vld [vmem:[#allocation7 + $0x58] sm:$0xff]   ;;  %v747_v46 = vld [vmem:[#allocation7 + $0x60] sm:$0xff]   ;;  %v749_v48 = vld [vmem:[#allocation7 + $0x68] sm:$0xff]   ;;  %v86_v52 = vsub.s32 0, %v85_v51  ;;  %v90_v54 = vsub.s32 1, %v85_v51 }
  0x59   :  { %375 = vmatpush1.bf16.msra.mxu1 %v702_v13  ;;  %656 = vmatprep.subr.bf16.mxu0 %v741_v40  ;;  %v746_v45 = vld [vmem:[#allocation7 + $0x18] sm:$0xff]   ;;  %v748_v47 = vld [vmem:[#allocation7 + $0x20] sm:$0xff]   ;;  %v750_v49 = vld [vmem:[#allocation7 + $0x28] sm:$0xff]  }
  0x5a   :  { %376 = vmatprep.subr.bf16.mxu1 %v703_v14  ;;  %v82_v53 = vld [vmem:[%s963_s2] ss:$2 sm:$0x3]  ;;  %v751_v3 = vld [vmem:[#allocation7 + $0x70] sm:$0xff]  }
  0x5b   :  { %v87_v55 = vrot.slane %v82_v53, %v86_v52  ;;  %v91_v56 = vrot.slane %v82_v53, %v90_v54  ;;  %v752_v4 = vld [vmem:[#allocation7 + $0x30] sm:$0xff]   ;;  %v753_v5 = vld [vmem:[#allocation7 + $0x78] sm:$0xff]  }
  0x5c   :  { %657 = vmatpush3.bf16.msra.mxu0 %v742_v41  ;;  %v754_v6 = vld [vmem:[#allocation7 + $0x38] sm:$0xff]  }
  0x5d   :  { %377 = vmatpush1.bf16.msra.mxu1 %v705_v15  ;;  %658 = vmatprep.subr.bf16.mxu0 %v743_v42  ;;  %v604_v7 = vld [vmem:[%s963_s2 + $0x1] ss:$2 sm:$0x3] }
  0x5e   :  { %378 = vmatprep.subr.bf16.mxu1 %v706_v16  ;;  %v201_v8 = vrot.slane %v604_v7, %v86_v52  ;;  %v205_v9 = vrot.slane %v604_v7, %v90_v54 }
  0x60   :  { %659 = vmatpush3.bf16.msra.mxu0 %v744_v43 }
  0x61   :  { %379 = vmatpush1.bf16.msra.mxu1 %v708_v17  ;;  %660 = vmatprep.subr.bf16.mxu0 %v745_v44 }
  0x62   :  { %380 = vmatprep.subr.bf16.mxu1 %v709_v18 }
  0x64   :  { %661 = vmatpush3.bf16.msra.mxu0 %v746_v45 }
  0x65   :  { %381 = vmatpush1.bf16.msra.mxu1 %v711_v19  ;;  %662 = vmatprep.subr.bf16.mxu0 %v747_v46 }
  0x66   :  { %382 = vmatprep.subr.bf16.mxu1 %v712_v20 }
  0x68   :  { %663 = vmatpush3.bf16.msra.mxu0 %v748_v47 }
  0x69   :  { %383 = vmatpush1.bf16.msra.mxu1 %v714_v21  ;;  %664 = vmatprep.subr.bf16.mxu0 %v749_v48 }
  0x6a   :  { %384 = vmatprep.subr.bf16.mxu1 %v715_v22  ;;  %v653_v22 = vld [vmem:[%s966_s5] ss:$0 sm:$0xff] }
  0x6c   :  { %665 = vmatpush3.bf16.msra.mxu0 %v750_v49 }
  0x6d   :  { %385 = vmatpush1.bf16.msra.mxu1 %v717_v23  ;;  %666 = vmatprep.subr.bf16.mxu0 %v751_v3 }
  0x6e   :  { %386 = vmatprep.subr.bf16.mxu1 %v718_v24 }
  0x70   :  { %667 = vmatpush3.bf16.msra.mxu0 %v752_v4 }
  0x71   :  { %387 = vmatpush1.bf16.msra.mxu1 %v720_v25  ;;  %668 = vmatprep.subr.bf16.mxu0 %v753_v5 }
  0x72   :  { %388 = vmatprep.subr.bf16.mxu1 %v721_v26 }
  0x74   :  { %669 = vmatpush3.bf16.msra.mxu0 %v754_v6 }
  0x75   :  { %389 = vmatpush1.bf16.msra.mxu1 %v723_v27 }
  0x76   :  { %390 = vmatprep.subr.bf16.mxu1 %v724_v28 }
  0x79   :  { %391 = vmatpush1.bf16.msra.mxu1 %v726_v29 }
  0x7a   :  { %392 = vmatprep.subr.bf16.mxu1 %v727_v30 }
  0x7d   :  { %393 = vmatpush1.bf16.msra.mxu1 %v729_v31 }
  0x7e   :  { %394 = vmatprep.subr.bf16.mxu1 %v730_v32 }
  0x81   :  { %395 = vmatpush1.bf16.msra.mxu1 %v732_v33 }
  0x82   :  { %396 = vmatprep.subr.bf16.mxu1 %v733_v34 }
  0x85   :  { %397 = vmatpush1.bf16.msra.mxu1 %v735_v35 }
  0x86   :  { %398 = vmatprep.subr.bf16.mxu1 %v736_v36 }
  0x89   :  { %399 = vmatpush1.bf16.msra.mxu1 %v738_v37 }
 0x125   :  { %v152_v57 = vpop.f32.mrb[0].mxu0 }
 0x126   :  { %v153_v58 = vadd.f32 %v152_v57, %v87_v55  ;;  %v154_v59 = vpop.f32.mrb[1].mxu0 }
 0x127   :  { %v155_v60 = vadd.f32 %v154_v59, %v91_v56  ;;  %v156_v61 = vpop.f32.mrb[2].mxu0 }
 0x128   :  { %v159_v62 = vmax.f32 %v153_v58, 0.0  ;;  %v157_v63 = vpop.f32.mrb[3].mxu0 }
 0x129   :  { %v160_v0 = vmax.f32 %v155_v60, 0.0 }
 0x12a   :  { %v161_v2 = vpack.c.bf16 %v159_v62, %v159_v62 }
 0x12b   :  { %v162_v1 = vpack.c.bf16 %v160_v0, %v160_v0 }
 0x12d   :  { %400 = vmatprep.mubr.bf16.mxu1 %v162_v1 }
 0x12e   :  { %401 = vmatmul.mubr.bf16.vlgmr.msra.gmra.mrb[0].mxu1 %v161_v2 }
 0x201   :  { %v402_v10 = vpop.f32.mrb[0].mxu1 }
 0x202   :  { %v403_v11 = vadd.f32 %v402_v10, %v201_v8  ;;  %v404_v12 = vpop.f32.mrb[1].mxu1 }
 0x203   :  { %v405_v13 = vadd.f32 %v404_v12, %v205_v9  ;;  %v406_v14 = vpop.f32.mrb[2].mxu1 }
 0x204   :  { %v409_v15 = vmax.f32 %v403_v11, 0.0  ;;  %v407_v16 = vpop.f32.mrb[3].mxu1 }
 0x205   :  { %v410_v17 = vmax.f32 %v405_v13, 0.0 }
 0x206   :  { %v411_v19 = vpack.c.bf16 %v409_v15, %v409_v15 }
 0x207   :  { %v412_v18 = vpack.c.bf16 %v410_v17, %v410_v17 }
 0x209   :  { %573 = vmatprep.mubr.bf16.mxu0 %v412_v18 }
 0x20a   :  { %574 = vmatmul.mubr.bf16.vlgmr.msra.gmra.mrb[4].mxu0 %v411_v19 }
 0x2dd   :  { %v670_v20 = vpop.f32.mrb[4].mxu0 }
 0x2de   :  { %v671_v21 = vpop.f32.mrb[5].mxu0 }
 0x2df   :  { %v672_v23 = vadd.f32 %v671_v21, %v670_v20  ;;  %v673_v24 = vpop.f32.mrb[6].mxu0 }
 0x2e0   :  { %v674_v25 = vpop.f32.mrb[7].mxu0 }
 0x2e1   :  { %v588_v26 = vadd.f32 %v672_v23, %v653_v22 }
 0x2e3   :  { %755 = vtanh.f32 %v588_v26 }
 0x2ed   :  { %v756_v27 = vpop.eup %755 }
 0x2ee   :  { %591 = vst.msk [vmem:[%s967_s6] sm:$0xff] %vm590_vm1, %v756_v27 }
 0x2ef   :  { %596 = vsyncpa [#allocation3], 1 }
 0x2f0   :  { %597 = vsyncpa [#allocation5], 1 }
 0x2f1   :  { %598 = vsyncpa [#allocation8], 1 }

</bundles_post_ra>
